<compile_context>
chip_gen: v5e
topology: v5e:2x2
jax: 0.10.0
libtpu: 0.0.40
codegen_flags: <defaults>
</compile_context>

<pallas_src>
import functools

import jax
import jax.numpy as jnp
import numpy as np
from jax.experimental import pallas as pl
from jax.experimental.pallas import tpu as pltpu


def _round_up(x, m):
    return ((x + m - 1) // m) * m


def _make_kernel(C_mid_p, l_tile, halo, kernel_size, dilation, compute_dtype):
    """Fused bottleneck kernel for one (batch element, L tile) grid step."""
    pad = (kernel_size - 1) * dilation
    f32 = jnp.float32

    def kernel(x_ref, w1_ref, b1_ref, w2_ref, b2_ref, w3_ref, wd_ref,
               bout_ref, o_ref, h1_ext_ref):
        l = pl.program_id(1)

        # ---- causal history carry across L tiles ---------------------------
        # h1_ext layout: [history (halo cols) | current h1 (l_tile cols)].
        # Only the last `pad` history columns are ever read.
        if pad > 0:
            @pl.when(l == 0)
            def _():
                # New batch element: history == causal zero padding.
                h1_ext_ref[:, pl.ds(0, halo)] = jnp.zeros(
                    (C_mid_p, halo), compute_dtype)

            @pl.when(l > 0)
            def _():
                # History = last `halo` columns of the previous tile's h1
                # (128-lane aligned copy; must run BEFORE h1 is overwritten).
                h1_ext_ref[:, pl.ds(0, halo)] = h1_ext_ref[:, pl.ds(l_tile, halo)]

        x = x_ref[0]                                           # (C_in_p, l_tile)

        # ---- pointwise layer 1: ReLU(W1 @ x + b1) ---------------------------
        h1 = jnp.dot(w1_ref[...], x, preferred_element_type=f32)
        h1 = jnp.maximum(h1 + b1_ref[...], 0.0)
        h1_ext_ref[:, pl.ds(halo, l_tile)] = h1.astype(compute_dtype)

        # ---- temporal layer: k accumulated dots over causal views ----------
        # tap j at out-time t reads h1[t - pad + j*dilation] (zeros before 0).
        acc = jnp.dot(w2_ref[0], h1_ext_ref[:, pl.ds(halo - pad, l_tile)],
                      preferred_element_type=f32)
        for j in range(1, kernel_size):
            tap = h1_ext_ref[:, pl.ds(halo - pad + j * dilation, l_tile)]
            acc = acc + jnp.dot(w2_ref[j], tap, preferred_element_type=f32)
        h2 = jnp.maximum(acc + b2_ref[...], 0.0)

        # ---- pointwise layer 2 + residual downsample (two dots, no concat) --
        out = jnp.dot(w3_ref[...], h2.astype(compute_dtype),
                      preferred_element_type=f32)
        out = out + jnp.dot(wd_ref[...], x, preferred_element_type=f32)
        o_ref[0] = jnp.maximum(out + bout_ref[...], 0.0).astype(o_ref.dtype)

    return kernel


def temporal_bottleneck_pallas(x_ncl, params, *, kernel_size, dilation,
                               compute_dtype=jnp.float32, l_tile=None):
    """x_ncl: (N, C_in, L) float32 in PyTorch Conv1d layout -> (N, C_out, L)."""
    w1, b1, w2, b2, w3, b3, wd, bd = params
    N, C_in, L = x_ncl.shape
    C_mid = w1.shape[0]
    C_out = w3.shape[0]
    pad = (kernel_size - 1) * dilation
    f32 = jnp.float32
    cdt = compute_dtype

    # Sublane/lane-dense padding (channels -> mult of 8/16, time -> mult of 128).
    sub = 16 if cdt == jnp.bfloat16 else 8
    C_in_p = _round_up(C_in, sub)
    C_mid_p = _round_up(C_mid, sub)
    C_out_p = _round_up(C_out, sub)

    halo = 0 if pad == 0 else _round_up(pad, 128)
    if l_tile is None:
        l_tile = min(512, _round_up(L, 128))
    l_tile = max(_round_up(l_tile, 128), halo, 128)
    L_pad = _round_up(L, l_tile)
    num_l = L_pad // l_tile

    def pad2(a, r, c):
        return jnp.pad(a, ((0, r - a.shape[0]), (0, c - a.shape[1])))

    # Host-side one-time re-layout / zero-padding / dtype cast (bf16 halves
    # HBM traffic; accumulation inside the kernel stays f32).
    x_p = jnp.pad(x_ncl, ((0, 0), (0, C_in_p - C_in), (0, L_pad - L))).astype(cdt)
    w1_p = pad2(w1[:, :, 0], C_mid_p, C_in_p).astype(cdt)
    w2_t = jnp.transpose(w2, (2, 0, 1))                        # (k, C_mid, C_mid)
    w2_p = jnp.pad(w2_t, ((0, 0), (0, C_mid_p - C_mid),
                          (0, C_mid_p - C_mid))).astype(cdt)
    w3_p = pad2(w3[:, :, 0], C_out_p, C_mid_p).astype(cdt)
    wd_p = pad2(wd[:, :, 0], C_out_p, C_in_p).astype(cdt)
    b1_p = jnp.pad(b1, (0, C_mid_p - C_mid)).reshape(C_mid_p, 1).astype(f32)
    b2_p = jnp.pad(b2, (0, C_mid_p - C_mid)).reshape(C_mid_p, 1).astype(f32)
    bout_p = jnp.pad(b3 + bd, (0, C_out_p - C_out)).reshape(C_out_p, 1).astype(f32)

    # Explicit VMEM budget: double-buffered in/out blocks + weights + carry
    # scratch, with 2x headroom, clamped to v7x's 64 MiB physical VMEM.
    isz = jnp.dtype(cdt).itemsize
    budget = (2 * (C_in_p * l_tile * isz + C_out_p * l_tile * 4)
              + 2 * (w1_p.size + w2_p.size + w3_p.size + wd_p.size) * isz
              + 2 * (b1_p.size + b2_p.size + bout_p.size) * 4
              + C_mid_p * (halo + l_tile) * isz)
    vmem_limit = int(min(64 * 2 ** 20, max(4 * 2 ** 20, 2 * budget)))

    kernel = _make_kernel(C_mid_p, l_tile, halo, kernel_size, dilation, cdt)

    out = pl.pallas_call(
        kernel,
        out_shape=jax.ShapeDtypeStruct((N, C_out_p, L_pad), f32),
        grid=(N, num_l),
        in_specs=[
            pl.BlockSpec((1, C_in_p, l_tile), lambda b, l: (b, 0, l)),      # x
            pl.BlockSpec((C_mid_p, C_in_p), lambda b, l: (0, 0)),           # W1
            pl.BlockSpec((C_mid_p, 1), lambda b, l: (0, 0)),                # b1
            pl.BlockSpec((kernel_size, C_mid_p, C_mid_p),
                         lambda b, l: (0, 0, 0)),                           # W2 taps
            pl.BlockSpec((C_mid_p, 1), lambda b, l: (0, 0)),                # b2
            pl.BlockSpec((C_out_p, C_mid_p), lambda b, l: (0, 0)),          # W3
            pl.BlockSpec((C_out_p, C_in_p), lambda b, l: (0, 0)),           # Wd
            pl.BlockSpec((C_out_p, 1), lambda b, l: (0, 0)),                # b3+bd
        ],
        out_specs=pl.BlockSpec((1, C_out_p, l_tile), lambda b, l: (b, 0, l)),
        scratch_shapes=[pltpu.VMEM((C_mid_p, halo + l_tile), cdt)],
        compiler_params=pltpu.CompilerParams(
            dimension_semantics=("parallel", "arbitrary"),
            vmem_limit_bytes=vmem_limit),
    )(x_p, w1_p, b1_p, w2_p, b2_p, w3_p, wd_p, bout_p)

    return out[:, :C_out, :L]


def _reference_forward(x_ncl, params, *, kernel_size, dilation):
    """Pure-JAX reference of the same forward (for correctness check)."""
    w1, b1, w2, b2, w3, b3, wd, bd = params
    L = x_ncl.shape[-1]
    pad = (kernel_size - 1) * dilation

    def conv1x1(x, w, b):
        return jnp.einsum('ncl,oc->nol', x, w[:, :, 0]) + b[None, :, None]

    h1 = jax.nn.relu(conv1x1(x_ncl, w1, b1))
    h2 = jax.lax.conv_general_dilated(
        h1, w2, window_strides=(1,), padding=[(pad, pad)],
        rhs_dilation=(dilation,), dimension_numbers=('NCH', 'OIH', 'NCH'))
    h2 = jax.nn.relu((h2 + b2[None, :, None])[:, :, :L])   # Chomp1d(pad)
    h3 = conv1x1(h2, w3, b3)
    res = conv1x1(x_ncl, wd, bd)
    return jax.nn.relu(h3 + res)


if __name__ == "__main__":
    # Module config: TemporalBottleneck(n_inputs=4, n_channels=(4, 16),
    #   kernel_size=3, stride=1, dilation=2, padding=(3-1)*2=4,
    #   batch_norm=False, groups=1, residual=True)  -> downsample is active.
    N, C_in, L = 2, 4, 16
    C_mid, C_out = 4, 16
    kernel_size, dilation = 3, 2

    key = jax.random.PRNGKey(0)
    keys = jax.random.split(key, 10)
    x = jax.random.normal(keys[0], (N, C_in, L), jnp.float32)

    # Conv1d-shaped parameters (deterministic, small scale).
    w1 = jax.random.normal(keys[1], (C_mid, C_in, 1), jnp.float32) * 0.3
    b1 = jax.random.normal(keys[2], (C_mid,), jnp.float32) * 0.1
    w2 = jax.random.normal(keys[3], (C_mid, C_mid, kernel_size), jnp.float32) * 0.3
    b2 = jax.random.normal(keys[4], (C_mid,), jnp.float32) * 0.1
    w3 = jax.random.normal(keys[5], (C_out, C_mid, 1), jnp.float32) * 0.3
    b3 = jax.random.normal(keys[6], (C_out,), jnp.float32) * 0.1
    wd = jax.random.normal(keys[7], (C_out, C_in, 1), jnp.float32) * 0.3
    bd = jax.random.normal(keys[8], (C_out,), jnp.float32) * 0.1
    params = (w1, b1, w2, b2, w3, b3, wd, bd)

    # 1) f32 path at the module's shapes.
    run_f32 = jax.jit(functools.partial(
        temporal_bottleneck_pallas, kernel_size=kernel_size, dilation=dilation,
        compute_dtype=jnp.float32))
    out = jax.block_until_ready(run_f32(x, params))
    ref = jax.block_until_ready(_reference_forward(
        x, params, kernel_size=kernel_size, dilation=dilation))
    assert out.shape == (N, C_out, L), out.shape
    np.testing.assert_allclose(np.asarray(out), np.asarray(ref),
                               rtol=1e-5, atol=1e-5)

    # 2) Multi-L-tile path (exercises the cross-tile causal carry), f32.
    L2 = 300
    x2 = jax.random.normal(keys[9], (N, C_in, L2), jnp.float32)
    run_tiled = jax.jit(functools.partial(
        temporal_bottleneck_pallas, kernel_size=kernel_size, dilation=dilation,
        compute_dtype=jnp.float32, l_tile=128))
    out2 = jax.block_until_ready(run_tiled(x2, params))
    ref2 = jax.block_until_ready(_reference_forward(
        x2, params, kernel_size=kernel_size, dilation=dilation))
    assert out2.shape == (N, C_out, L2), out2.shape
    np.testing.assert_allclose(np.asarray(out2), np.asarray(ref2),
                               rtol=1e-5, atol=1e-5)

    # 3) bf16 boundary cast (memory-bound production path), looser tolerance.
    run_bf16 = jax.jit(functools.partial(
        temporal_bottleneck_pallas, kernel_size=kernel_size, dilation=dilation,
        compute_dtype=jnp.bfloat16))
    out3 = jax.block_until_ready(run_bf16(x, params))
    np.testing.assert_allclose(np.asarray(out3), np.asarray(ref),
                               rtol=5e-2, atol=5e-2)

    print("KERNEL_OK")
</pallas_src>

<mosaic_0001>
module attributes {stable_mosaic.version = 11 : i64} {
  func.func @kernel(%arg0: i32, %arg1: i32, %arg2: memref<1x8x128xf32, #tpu.memory_space<vmem>>, %arg3: memref<8x8xf32, #tpu.memory_space<vmem>>, %arg4: memref<8x1xf32, #tpu.memory_space<vmem>>, %arg5: memref<3x8x8xf32, #tpu.memory_space<vmem>>, %arg6: memref<8x1xf32, #tpu.memory_space<vmem>>, %arg7: memref<16x8xf32, #tpu.memory_space<vmem>>, %arg8: memref<16x8xf32, #tpu.memory_space<vmem>>, %arg9: memref<16x1xf32, #tpu.memory_space<vmem>>, %arg10: memref<1x16x128xf32, #tpu.memory_space<vmem>>, %arg11: memref<8x256xf32, #tpu.memory_space<vmem>>) attributes {dimension_semantics = [#tpu.dimension_semantics<parallel>, #tpu.dimension_semantics<arbitrary>], iteration_bounds = array<i64: 2, 1>, scalar_prefetch = 0 : i64, scratch_operands = 1 : i64, tpu.core_type = #tpu.core_type<tc>, window_params = [{transform_indices = @transform_0, window_bounds = array<i64: 1, 8, 128>}, {pipeline_mode = #tpu.pipeline_mode<synchronous>, transform_indices = @transform_1, window_bounds = array<i64: 8, 8>}, {pipeline_mode = #tpu.pipeline_mode<synchronous>, transform_indices = @transform_2, window_bounds = array<i64: 8, 1>}, {pipeline_mode = #tpu.pipeline_mode<synchronous>, transform_indices = @transform_3, window_bounds = array<i64: 3, 8, 8>}, {pipeline_mode = #tpu.pipeline_mode<synchronous>, transform_indices = @transform_4, window_bounds = array<i64: 8, 1>}, {pipeline_mode = #tpu.pipeline_mode<synchronous>, transform_indices = @transform_5, window_bounds = array<i64: 16, 8>}, {pipeline_mode = #tpu.pipeline_mode<synchronous>, transform_indices = @transform_6, window_bounds = array<i64: 16, 8>}, {pipeline_mode = #tpu.pipeline_mode<synchronous>, transform_indices = @transform_7, window_bounds = array<i64: 16, 1>}, {transform_indices = @transform_8, window_bounds = array<i64: 1, 16, 128>}]} {
    %c0_i32 = arith.constant 0 : i32
    %0 = arith.cmpi eq, %arg1, %c0_i32 : i32
    %1 = arith.extui %0 : i1 to i32
    %c0_i32_0 = arith.constant 0 : i32
    %2 = arith.cmpi ne, %1, %c0_i32_0 : i32
    scf.if %2 {
      %cst_40 = arith.constant 0.000000e+00 : f32
      %48 = vector.broadcast %cst_40 : f32 to vector<8x128xf32>
      %c0_41 = arith.constant 0 : index
      %c0_42 = arith.constant 0 : index
      %49 = vector.load %arg11[%c0_41, %c0_42] : memref<8x256xf32, #tpu.memory_space<vmem>>, vector<8x128xf32>
      tpu.vector_store %arg11[%c0_41, %c0_42], %48 {strides = array<i32>} : memref<8x256xf32, #tpu.memory_space<vmem>>, vector<8x128xf32>,
    } else {
    }
    %c0_i32_1 = arith.constant 0 : i32
    %3 = arith.cmpi sgt, %arg1, %c0_i32_1 : i32
    %4 = arith.extui %3 : i1 to i32
    %c0_i32_2 = arith.constant 0 : i32
    %5 = arith.cmpi ne, %4, %c0_i32_2 : i32
    scf.if %5 {
      %c0_40 = arith.constant 0 : index
      %c128_41 = arith.constant 128 : index
      %48 = vector.load %arg11[%c0_40, %c128_41] : memref<8x256xf32, #tpu.memory_space<vmem>>, vector<8x128xf32>
      %c0_42 = arith.constant 0 : index
      %c0_43 = arith.constant 0 : index
      %49 = vector.load %arg11[%c0_42, %c0_43] : memref<8x256xf32, #tpu.memory_space<vmem>>, vector<8x128xf32>
      tpu.vector_store %arg11[%c0_42, %c0_43], %48 {strides = array<i32>} : memref<8x256xf32, #tpu.memory_space<vmem>>, vector<8x128xf32>,
    } else {
    }
    %c0 = arith.constant 0 : index
    %c0_3 = arith.constant 0 : index
    %c0_4 = arith.constant 0 : index
    %6 = vector.load %arg2[%c0, %c0_3, %c0_4] : memref<1x8x128xf32, #tpu.memory_space<vmem>>, vector<1x8x128xf32>
    %7 = vector.shape_cast %6 : vector<1x8x128xf32> to vector<8x128xf32>
    %c0_5 = arith.constant 0 : index
    %c0_6 = arith.constant 0 : index
    %8 = vector.load %arg3[%c0_5, %c0_6] : memref<8x8xf32, #tpu.memory_space<vmem>>, vector<8x8xf32>
    %cst = arith.constant dense<0.000000e+00> : vector<8x128xf32>
    %9 = tpu.matmul %8, %7, %cst {dimension_numbers = #tpu.dot_dimension_numbers<[1], [0], [0], [1], [0, 0, 1, 1], [], []>} : vector<8x8xf32>, vector<8x128xf32>, vector<8x128xf32> -> vector<8x128xf32>
    %c0_7 = arith.constant 0 : index
    %c0_8 = arith.constant 0 : index
    %10 = vector.load %arg4[%c0_7, %c0_8] : memref<8x1xf32, #tpu.memory_space<vmem>>, vector<8x1xf32>
    %11 = vector.broadcast %10 : vector<8x1xf32> to vector<8x128xf32>
    %12 = arith.addf %9, %11 : vector<8x128xf32>
    %cst_9 = arith.constant 0.000000e+00 : f32
    %13 = vector.broadcast %cst_9 : f32 to vector<8x128xf32>
    %14 = arith.maximumf %12, %13 : vector<8x128xf32>
    %c0_10 = arith.constant 0 : index
    %c128 = arith.constant 128 : index
    %15 = vector.load %arg11[%c0_10, %c128] : memref<8x256xf32, #tpu.memory_space<vmem>>, vector<8x128xf32>
    tpu.vector_store %arg11[%c0_10, %c128], %14 {strides = array<i32>} : memref<8x256xf32, #tpu.memory_space<vmem>>, vector<8x128xf32>,
    %c0_11 = arith.constant 0 : index
    %c0_12 = arith.constant 0 : index
    %c0_13 = arith.constant 0 : index
    %16 = vector.load %arg5[%c0_11, %c0_12, %c0_13] : memref<3x8x8xf32, #tpu.memory_space<vmem>>, vector<1x8x8xf32>
    %17 = vector.shape_cast %16 : vector<1x8x8xf32> to vector<8x8xf32>
    %c0_14 = arith.constant 0 : index
    %c124 = arith.constant 124 : index
    %18 = vector.load %arg11[%c0_14, %c124] : memref<8x256xf32, #tpu.memory_space<vmem>>, vector<8x128xf32>
    %cst_15 = arith.constant dense<0.000000e+00> : vector<8x128xf32>
    %19 = tpu.matmul %17, %18, %cst_15 {dimension_numbers = #tpu.dot_dimension_numbers<[1], [0], [0], [1], [0, 0, 1, 1], [], []>} : vector<8x8xf32>, vector<8x128xf32>, vector<8x128xf32> -> vector<8x128xf32>
    %c0_16 = arith.constant 0 : index
    %c126 = arith.constant 126 : index
    %20 = vector.load %arg11[%c0_16, %c126] : memref<8x256xf32, #tpu.memory_space<vmem>>, vector<8x128xf32>
    %c1 = arith.constant 1 : index
    %c0_17 = arith.constant 0 : index
    %c0_18 = arith.constant 0 : index
    %21 = vector.load %arg5[%c1, %c0_17, %c0_18] : memref<3x8x8xf32, #tpu.memory_space<vmem>>, vector<1x8x8xf32>
    %22 = vector.shape_cast %21 : vector<1x8x8xf32> to vector<8x8xf32>
    %cst_19 = arith.constant dense<0.000000e+00> : vector<8x128xf32>
    %23 = tpu.matmul %22, %20, %cst_19 {dimension_numbers = #tpu.dot_dimension_numbers<[1], [0], [0], [1], [0, 0, 1, 1], [], []>} : vector<8x8xf32>, vector<8x128xf32>, vector<8x128xf32> -> vector<8x128xf32>
    %24 = arith.addf %19, %23 : vector<8x128xf32>
    %c0_20 = arith.constant 0 : index
    %c128_21 = arith.constant 128 : index
    %25 = vector.load %arg11[%c0_20, %c128_21] : memref<8x256xf32, #tpu.memory_space<vmem>>, vector<8x128xf32>
    %c2 = arith.constant 2 : index
    %c0_22 = arith.constant 0 : index
    %c0_23 = arith.constant 0 : index
    %26 = vector.load %arg5[%c2, %c0_22, %c0_23] : memref<3x8x8xf32, #tpu.memory_space<vmem>>, vector<1x8x8xf32>
    %27 = vector.shape_cast %26 : vector<1x8x8xf32> to vector<8x8xf32>
    %cst_24 = arith.constant dense<0.000000e+00> : vector<8x128xf32>
    %28 = tpu.matmul %27, %25, %cst_24 {dimension_numbers = #tpu.dot_dimension_numbers<[1], [0], [0], [1], [0, 0, 1, 1], [], []>} : vector<8x8xf32>, vector<8x128xf32>, vector<8x128xf32> -> vector<8x128xf32>
    %29 = arith.addf %24, %28 : vector<8x128xf32>
    %c0_25 = arith.constant 0 : index
    %c0_26 = arith.constant 0 : index
    %30 = vector.load %arg6[%c0_25, %c0_26] : memref<8x1xf32, #tpu.memory_space<vmem>>, vector<8x1xf32>
    %31 = vector.broadcast %30 : vector<8x1xf32> to vector<8x128xf32>
    %32 = arith.addf %29, %31 : vector<8x128xf32>
    %cst_27 = arith.constant 0.000000e+00 : f32
    %33 = vector.broadcast %cst_27 : f32 to vector<8x128xf32>
    %34 = arith.maximumf %32, %33 : vector<8x128xf32>
    %c0_28 = arith.constant 0 : index
    %c0_29 = arith.constant 0 : index
    %35 = vector.load %arg7[%c0_28, %c0_29] : memref<16x8xf32, #tpu.memory_space<vmem>>, vector<16x8xf32>
    %cst_30 = arith.constant dense<0.000000e+00> : vector<16x128xf32>
    %36 = tpu.matmul %35, %34, %cst_30 {dimension_numbers = #tpu.dot_dimension_numbers<[1], [0], [0], [1], [0, 0, 1, 1], [], []>} : vector<16x8xf32>, vector<8x128xf32>, vector<16x128xf32> -> vector<16x128xf32>
    %c0_31 = arith.constant 0 : index
    %c0_32 = arith.constant 0 : index
    %37 = vector.load %arg8[%c0_31, %c0_32] : memref<16x8xf32, #tpu.memory_space<vmem>>, vector<16x8xf32>
    %cst_33 = arith.constant dense<0.000000e+00> : vector<16x128xf32>
    %38 = tpu.matmul %37, %7, %cst_33 {dimension_numbers = #tpu.dot_dimension_numbers<[1], [0], [0], [1], [0, 0, 1, 1], [], []>} : vector<16x8xf32>, vector<8x128xf32>, vector<16x128xf32> -> vector<16x128xf32>
    %39 = arith.addf %36, %38 : vector<16x128xf32>
    %c0_34 = arith.constant 0 : index
    %c0_35 = arith.constant 0 : index
    %40 = vector.load %arg9[%c0_34, %c0_35] : memref<16x1xf32, #tpu.memory_space<vmem>>, vector<16x1xf32>
    %41 = vector.broadcast %40 : vector<16x1xf32> to vector<16x128xf32>
    %42 = arith.addf %39, %41 : vector<16x128xf32>
    %cst_36 = arith.constant 0.000000e+00 : f32
    %43 = vector.broadcast %cst_36 : f32 to vector<16x128xf32>
    %44 = arith.maximumf %42, %43 : vector<16x128xf32>
    %c0_37 = arith.constant 0 : index
    %c0_38 = arith.constant 0 : index
    %c0_39 = arith.constant 0 : index
    %45 = vector.load %arg10[%c0_37, %c0_38, %c0_39] : memref<1x16x128xf32, #tpu.memory_space<vmem>>, vector<1x16x128xf32>
    %46 = vector.shape_cast %45 : vector<1x16x128xf32> to vector<16x128xf32>
    %47 = vector.shape_cast %44 : vector<16x128xf32> to vector<1x16x128xf32>
    tpu.vector_store %arg10[%c0_37, %c0_38, %c0_39], %47 {strides = array<i32>} : memref<1x16x128xf32, #tpu.memory_space<vmem>>, vector<1x16x128xf32>,
    return
  }
  func.func @transform_0(%arg0: i32, %arg1: i32) -> (i32, i32, i32) {
    %c0_i32 = arith.constant 0 : i32
    %c0_i32_0 = arith.constant 0 : i32
    return %arg0, %c0_i32, %arg1 : i32, i32, i32
  }
  func.func @transform_1(%arg0: i32, %arg1: i32) -> (i32, i32) {
    %c0_i32 = arith.constant 0 : i32
    %c0_i32_0 = arith.constant 0 : i32
    %c0_i32_1 = arith.constant 0 : i32
    return %c0_i32, %c0_i32_0 : i32, i32
  }
  func.func @transform_2(%arg0: i32, %arg1: i32) -> (i32, i32) {
    %c0_i32 = arith.constant 0 : i32
    %c0_i32_0 = arith.constant 0 : i32
    %c0_i32_1 = arith.constant 0 : i32
    return %c0_i32, %c0_i32_0 : i32, i32
  }
  func.func @transform_3(%arg0: i32, %arg1: i32) -> (i32, i32, i32) {
    %c0_i32 = arith.constant 0 : i32
    %c0_i32_0 = arith.constant 0 : i32
    %c0_i32_1 = arith.constant 0 : i32
    %c0_i32_2 = arith.constant 0 : i32
    return %c0_i32, %c0_i32_0, %c0_i32_1 : i32, i32, i32
  }
  func.func @transform_4(%arg0: i32, %arg1: i32) -> (i32, i32) {
    %c0_i32 = arith.constant 0 : i32
    %c0_i32_0 = arith.constant 0 : i32
    %c0_i32_1 = arith.constant 0 : i32
    return %c0_i32, %c0_i32_0 : i32, i32
  }
  func.func @transform_5(%arg0: i32, %arg1: i32) -> (i32, i32) {
    %c0_i32 = arith.constant 0 : i32
    %c0_i32_0 = arith.constant 0 : i32
    %c0_i32_1 = arith.constant 0 : i32
    return %c0_i32, %c0_i32_0 : i32, i32
  }
  func.func @transform_6(%arg0: i32, %arg1: i32) -> (i32, i32) {
    %c0_i32 = arith.constant 0 : i32
    %c0_i32_0 = arith.constant 0 : i32
    %c0_i32_1 = arith.constant 0 : i32
    return %c0_i32, %c0_i32_0 : i32, i32
  }
  func.func @transform_7(%arg0: i32, %arg1: i32) -> (i32, i32) {
    %c0_i32 = arith.constant 0 : i32
    %c0_i32_0 = arith.constant 0 : i32
    %c0_i32_1 = arith.constant 0 : i32
    return %c0_i32, %c0_i32_0 : i32, i32
  }
  func.func @transform_8(%arg0: i32, %arg1: i32) -> (i32, i32, i32) {
    %c0_i32 = arith.constant 0 : i32
    %c0_i32_0 = arith.constant 0 : i32
    return %arg0, %c0_i32, %arg1 : i32, i32, i32
  }
}

</mosaic_0001>

<bundles_post_ra>
// kernel: temporal_bottleneck_pallas.1
= control target key start
LH: loop header
LB: loop body
LE: loop exit
PB: predicated region body
PF: predicated region fallthrough
CT: control target
= control target key end

     0   :  { %13 = vsyncpa [#allocation4], 0  ;;  %s1013_s0 = inlined_call_operand.vmem [shape: f32[2,8,128], index: 0, kind: input, shape index: {}]   ;;  %s1014_s1 = inlined_call_operand.vmem [shape: f32[8,8], index: 1, kind: input, shape index: {}]   ;;  %s1015_s2 = inlined_call_operand.vmem [shape: f32[8,1], index: 2, kind: input, shape index: {}]   ;;  %s1016_s3 = inlined_call_operand.vmem [shape: f32[3,8,8], index: 3, kind: input, shape index: {}]   ;;  %s1017_s4 = inlined_call_operand.vmem [shape: f32[8,1], index: 4, kind: input, shape index: {}]   ;;  %s1018_s5 = inlined_call_operand.vmem [shape: f32[16,8], index: 5, kind: input, shape index: {}]   ;;  %s1019_s6 = inlined_call_operand.vmem [shape: f32[16,8], index: 6, kind: input, shape index: {}]   ;;  %s1020_s7 = inlined_call_operand.vmem [shape: f32[16,1], index: 7, kind: input, shape index: {}]   ;;  %s1021_s8 = inlined_call_operand.hbm [shape: f32[2,16,128], index: 8, kind: output, shape index: {}]  }
   0x1   :  { %15 = vsyncpa [#allocation4 + $0x1], 0  ;;  %s872_s27 = smov 0   ;;  %s874_s28 = smov 0  }
   0x2   :  { %s876_s29 = smov 0   ;;  %s878_s30 = smov 0  }
   0x3   :  { %s880_s9 = smov 0   ;;  %s882_s10 = smov 0  }
   0x4 LB: > { %s644_s11 = sadd.s32 4294967295, %s819_s10   ;;  %s645_s12 = sadd.s32 4294967294, %s819_s10   ;;  %s819_s10 = sphi %s882_s10, %s21_s10   ;;  %s815_s9 = sphi %s880_s9, %s1028_s9   ;;  %s811_s30 = sphi %s878_s30, %s1027_s30   ;;  %s807_s29 = sphi %s876_s29, %s1026_s29   ;;  %s803_s28 = sphi %s874_s28, %s1025_s28   ;;  %s799_s27 = sphi %s872_s27, %s1024_s27  }
   0x5   : > { %s33_s13 = sadd.s32 1, %s815_s9  ;;  %s217_s14 = sadd.s32 1, %s807_s29 }
   0x6   : > { %p35_p0 = scmp.ge.s32.totalorder %s33_s13, 2  ;;  %p227_p1 = scmp.ne.s32.totalorder %s807_s29, %s803_s28 }
   0x7   : > { %p228_p2 = scmp.eq.s32.totalorder %s644_s11, 1  ;;  %p233_p3 = scmp.ne.s32.totalorder %s803_s28, %s799_s27 }
   0x8   : > { %s1030_s13 = smov (%p35_p0, %s33_s13), 0  ;;  %p234_p5 = scmp.eq.s32.totalorder %s645_s12, 1 }
   0x9   : > { %p912_p4 = por %p228_p2, %p227_p1  ;;  %s212_s16 = ssub.s32 %s815_s9, %s1030_s13 }
   0xa   : > { %p648_p6 = scmp.ge.s32.totalorder %s819_s10, 1  ;;  %p215_p7 = scmp.eq.s32.totalorder %s212_s16, 0 }
   0xb   : > { %p919_p8 = por %p234_p5, %p233_p3  ;;  %p283_p9 = scmp.lt.s32.totalorder %s819_s10, 3 }
   0xc   : > { %s925_s18 = scalar_select %p215_p7, %s807_s29, %s217_s14  }
   0xd   : > { %p284_p10 = pnand %p648_p6, %p283_p9 }
   0xe   : > { %p319_p11 = scmp.lt.s32.totalorder (!%p284_p10), %s811_s30, 1  ;;  %s823_s12 = smov (!%p284_p10), 4  }
   0xf   : > { %287 = sbr.rel (%p284_p10) target bundleno = 574 (0x23e), region = 52  ;;  %s824_s14 = smov (!%p284_p10), 2  }
  0x10   : > { %s316_s26 = sand.u32 (!%p284_p10), 1, %s803_s28  }
  0x11   : > { %s649_s11 = sshll.u32 (!%p284_p10), %s316_s26, 4 }
  0x14   : > { %v339_v0 = vld [vmem:[%s1015_s2] sm:$0xff]  ;;  %v821_v1 = vmov 0   ;;  %s320_s21 = scalar_select %p319_p11, %s811_s30, 1  ;;  %vm345_vm0 = vcmask 64512   ;;  %v822_v8 = vmov 0.0   ;;  %vm382_vm1 = vcmask 15360  }
  0x15   : > { %728 = vset.pattern.permute.xlu0 %v821_v1  ;;  %739 = vset.pattern.permute.xlu1 %v821_v1  ;;  %v338_v2 = vld [vmem:[%s1014_s1] sm:$0xff]  ;;  %vm412_vm2 = vcmask 31744   ;;  %v652_v17 = vld [vmem:[%s1016_s3 + $0x8] sm:$0xff]  ;;  %v655_v21 = vld [vmem:[%s1016_s3 + $0x10] sm:$0xff] }
  0x16   : > { %342 = vperm.xlu0 %728, %v339_v0   ;;  %740 = vset.pattern.permute.xlu2 %v821_v1  ;;  %s650_s22 = sshll.u32 %s320_s21, 3  ;;  %v464_v10 = vld [vmem:[%s1017_s4] sm:$0xff]  ;;  %v475_v23 = vld [vmem:[%s1019_s6 + $0x8] sm:$0xff] }
  0x17   : > { %s325_s25 = scalar_lea.vmem %s1013_s0, %s650_s22  ;;  %v371_v18 = vld [vmem:[%s1016_s3] sm:$0xff]  ;;  %v535_v25 = vld [vmem:[%s1020_s7 + $0x8] sm:$0xff] }
  0x18   : > { %v337_v3 = vld [vmem:[%s325_s25] sm:$0xff]  ;;  %v473_v35 = vld [vmem:[%s1018_s5 + $0x8] sm:$0xff] }
  0x19   : > { %364 = vmatpush.msra.mxu2 %v337_v3  ;;  %497 = vmatpush.msra.mxu0 %v337_v3  ;;  %v474_v22 = vld [vmem:[%s1019_s6] sm:$0xff] }
  0x1a   : > { %651 = vmatmul.msk.f32.vlgmr.msra.gmra.mxu2 %vm345_vm0, %v338_v2  ;;  %657 = vmatmul.msk.f32.vlgmr.msra.gmra.mxu0 %vm345_vm0, %v474_v22  ;;  %v534_v24 = vld [vmem:[%s1020_s7] sm:$0xff] }
  0x1b   : > { %538 = vperm.xlu2 %740, %v534_v24   ;;  %v472_v34 = vld [vmem:[%s1018_s5] sm:$0xff] }
  0x22   : > { %658 = vmatmul.msk.f32.gmra.mxu0 %vm345_vm0, %v475_v23 }
  0x23   : > { %543 = vperm.xlu2 %740, %v535_v25  }
  0x75   : > { %v539_v37 = vpop.permute.xlu2 %538 }
  0x7d   : > { %v544_v45 = vpop.permute.xlu2 %543 }
  0x88   : > { %v343_v4 = vpop.permute.xlu0 %342 }
  0x97   : > { %v499_v36 = vpop.f32.mrf.mxu0 }
  0x9d   : > { %v366_v5 = vpop.f32.mrf.mxu2 }
  0x9e   : > { %v367_v6 = vadd.f32 %v366_v5, %v343_v4 }
  0x9f   : > { %v502_v42 = vpop.f32.mrf.mxu0 }
  0xa0   : > { %v369_v7 = vmax.f32 %v367_v6, 0.0 }
  0xa2   : > { %v734_v9 = vpack.i.bf16 %v369_v7, %v822_v8 }
  0xa4   : > { %735 = vrot.lane.b32.xlu1 %v734_v9, %s823_s12  ;;  %730 = vrot.lane.b32.xlu0 %v734_v9, %s824_s14  ;;  %s666_s12 = sshll.u32 %s811_s30, 4  ;;  %s318_s14 = scalar_lea.vmem [#allocation3], %s649_s11 }
  0xa5   : > { %s565_s20 = scalar_lea.hbm %s1021_s8, %s666_s12  ;;  %s566_s21 = sshll.u32 %s318_s14, 4  ;;  %s567_s21 = int_to_ptr.vmem [resolvable:$true] %s566_s21 }
  0xa6   : > { %s568_s22 = sshll.u32 %s565_s20, 4  ;;  %s553_s30 = scalar_lea.sflag [#allocation4], %s316_s26  ;;  %s569_s22 = int_to_ptr.hbm [resolvable:$true] %s568_s22 }
  0xa7   : > { %s755_s23 = sshra.s32 %s569_s22, 4  ;;  %s761_s12 = scalar_lea.hbm %s1021_s8, 32  ;;  %s756_s23 = int_to_ptr.hbm [resolvable:$true] %s755_s23 }
  0xa8   : > { %s757_s24 = scalar_lea.hbm %s756_s23, 16  ;;  %p762_p1 = scmp.lt.s32.totalorder %s756_s23, %s1021_s8 }
  0xa9   : > { %p758_p12 = scmp.ne.s32.totalorder %s756_s23, %s757_s24  ;;  %p763_p2 = scmp.lt.s32.totalorder %s761_s12, %s757_s24 }
  0xab   : > { %p759_p13 = pnand %p758_p12, %p912_p4  ;;  %p764_p3 = por %p763_p2, %p762_p1 }
  0xac   : > { %467 = vperm.xlu1 %739, %v464_v10  }
  0xad   : > { %p760_p0 = pneg %p759_p13 }
  0xaf   : > { %p765_p5 = pnand %p764_p3, %p760_p0 }
 0x116   : > { %v736_v11 = vpop.permute.xlu1 %735  ;;  %v731_v12 = vpop.permute.xlu0 %730 }
 0x117   : > { %v738_v13 = vunpack.i.h.bf16 %v736_v11  ;;  %v737_v14 = vunpack.i.l.bf16 %v736_v11  ;;  %v733_v15 = vunpack.i.h.bf16 %v731_v12  ;;  %v732_v16 = vunpack.i.l.bf16 %v731_v12 }
 0x119   : > { %v383_v19 = vsel %vm382_vm1, %v732_v16, %v733_v15  ;;  %v413_v20 = vsel %vm412_vm2, %v737_v14, %v738_v13 }
 0x11a   : > { %403 = vmatpush.msra.mxu3 %v383_v19  ;;  %433 = vmatpush.msrb.mxu2 %v413_v20 }
 0x11b   : > { %653 = vmatmul.msk.f32.vlgmr.msra.gmra.mxu3 %vm345_vm0, %v652_v17  ;;  %654 = vmatmul.msk.f32.vlgmr.msrb.gmra.mxu2 %vm345_vm0, %v371_v18 }
 0x11c   : > { %458 = vmatpush.msrb.mxu3 %v369_v7 }
 0x11e   : > { %v468_v30 = vpop.permute.xlu1 %467 }
 0x123   : > { %656 = vmatmul.msk.f32.vlgmr.msrb.gmra.mxu3 %vm345_vm0, %v655_v21 }
 0x19e   : > { %v405_v26 = vpop.f32.mrf.mxu3  ;;  %v435_v27 = vpop.f32.mrf.mxu2 }
 0x19f   : > { %v436_v28 = vadd.f32 %v435_v27, %v405_v26 }
 0x1a6   : > { %v460_v29 = vpop.f32.mrf.mxu3 }
 0x1a7   : > { %v463_v31 = vadd.f32 %v460_v29, %v436_v28 }
 0x1a9   : > { %v470_v32 = vadd.f32 %v468_v30, %v463_v31 }
 0x1ab   : > { %v471_v33 = vmax.f32 %v470_v32, 0.0 }
 0x1ad   : > { %526 = vmatpush.msra.mxu1 %v471_v33 }
 0x1ae   : > { %659 = vmatmul.msk.f32.vlgmr.msra.gmra.mxu1 %vm345_vm0, %v472_v34 }
 0x1b6   : > { %660 = vmatmul.msk.f32.gmra.mxu1 %vm345_vm0, %v473_v35 }
 0x22b   : > { %v528_v38 = vpop.f32.mrf.mxu1 }
 0x22c   : > { %v529_v39 = vadd.f32 %v528_v38, %v499_v36 }
 0x22e   : > { %v546_v40 = vadd.f32 %v539_v37, %v529_v39 }
 0x230   : > { %v548_v41 = vmax.f32 %v546_v40, 0.0 }
 0x232   : > { %550 = vst [vmem:[%s318_s14] sm:$0xff] %v548_v41 }
 0x233   : > { %v531_v43 = vpop.f32.mrf.mxu1 }
 0x234   : > { %v532_v44 = vadd.f32 %v531_v43, %v502_v42 }
 0x236   : > { %v547_v46 = vadd.f32 %v544_v45, %v532_v44 }
 0x238   : > { %v549_v47 = vmax.f32 %v547_v46, 0.0 }
 0x23a   : > { %551 = vst [vmem:[%s318_s14 + $0x8] sm:$0xff] %v549_v47 }
 0x23b   : > { %768 = shalt.err (!%p765_p5)
}
 0x23c   : > { %s825_s26 = smov 128   ;;  %s826_s14 = smov 8  }
 0x23d   : > { %667 = dma.vmem_to_hbm [thread:$0]  (%p912_p4), %s567_s21, 256, %s569_s22, %s553_s30, %s825_s26, %s825_s26, %s826_s14  }
 0x23e PF: > { %p673_p6 = scmp.ge.s32.totalorder %s819_s10, 2  ;;  %s583_s20 = sand.u32 1, %s799_s27  }
 0x23f   : > { %s584_s25 = scalar_lea.sflag [#allocation4], %s583_s20 }
 0x240   : > { %p670_p7 = pnand %p673_p6, %p919_p8 }
 0x242   : > { %p671_p9 = pneg %p670_p7 }
 0x244   : > { %794 = dma.done.wait (%p671_p9), %s584_s25, 256  }
 0x245   : > { %796 = vsyncadd (%p671_p9), %s584_s25, 4294967040  ;;  %s21_s10 = sadd.s32 1, %s819_s10   ;;  %s1024_s27 = smov %s803_s28 }
 0x246   : > { %p18_p10 = scmp.ge.s32.totalorder %s21_s10, 4   ;;  %s1025_s28 = smov %s807_s29 }
 0x247   : > { %s1026_s29 = smov %s925_s18  ;;  %s1027_s30 = smov %s815_s9 }
 0x248   : > { %s1028_s9 = smov %s1030_s13  ;;  %20 = sbr.rel (!%p18_p10) target bundleno = 4 (0x4), region = 97 }
 0x24d   :  { %590 = vsyncpa [#allocation4], 1 }
 0x24e   :  { %592 = vsyncpa [#allocation4 + $0x1], 1 }

</bundles_post_ra>
